<compile_context>
chip_gen: v6e
topology: v6e:2x2x1
jax: 0.10.0
libtpu: 0.0.40
codegen_flags: <defaults>
</compile_context>

<pallas_src>
import functools

import jax
import jax.numpy as jnp
from jax.experimental import pallas as pl
from jax.experimental.pallas import tpu as pltpu

IN_FEATURES = 40
OUT_FEATURES = 30


def nestmlp_kernel(x_ref, w_ref, b_ref, o_ref):
    # x_ref: (TB, IN)   w_ref: (IN, OUT) f32 resident   b_ref: (1, OUT) f32
    # o_ref: (TB, OUT)
    x = x_ref[...]
    w = w_ref[...].astype(x.dtype)     # no-op for f32 x; bf16 MXU op for bf16 x
    y = jnp.dot(x, w, preferred_element_type=jnp.float32)   # f32 accumulate
    y = y + b_ref[...]                                       # f32 bias broadcast
    o_ref[...] = jnp.maximum(y, 0.0).astype(o_ref.dtype)     # ReLU + store cast


def _round_up(x, m):
    return ((x + m - 1) // m) * m


@functools.partial(jax.jit, static_argnames=("tb", "out_dtype"))
def nestmlp_forward(x, weight, bias, *, tb=8192, out_dtype=jnp.float32):
    """x: (B, 40) (f32 or bf16); weight: (30, 40) PyTorch layout; bias: (30,).

    Returns (B, 30) in `out_dtype`.
    """
    B = x.shape[0]

    # Layout glue only (no extra passes over the dominant x stream):
    w_t = weight.T.astype(jnp.float32)                      # (IN, OUT), VMEM-resident
    b_row = bias.astype(jnp.float32).reshape(1, OUT_FEATURES)

    # Batch tile: multiple of 8 sublanes; large default to amortize per-step
    # overhead.  Tail block (B % TB != 0) is handled by Pallas masking.
    TB = min(_round_up(tb, 8), _round_up(B, 8))
    grid = (pl.cdiv(B, TB),)

    bytes_accessed = (x.size * x.dtype.itemsize
                      + w_t.size * 4 + b_row.size * 4
                      + B * OUT_FEATURES * jnp.dtype(out_dtype).itemsize)

    out = pl.pallas_call(
        nestmlp_kernel,
        out_shape=jax.ShapeDtypeStruct((B, OUT_FEATURES), out_dtype),
        grid=grid,
        in_specs=[
            pl.BlockSpec((TB, IN_FEATURES), lambda i: (i, 0)),           # streamed x
            pl.BlockSpec((IN_FEATURES, OUT_FEATURES), lambda i: (0, 0)), # resident W
            pl.BlockSpec((1, OUT_FEATURES), lambda i: (0, 0)),           # resident b
        ],
        out_specs=pl.BlockSpec((TB, OUT_FEATURES), lambda i: (i, 0)),
        compiler_params=pltpu.CompilerParams(
            dimension_semantics=("parallel",),   # split batch tiles across TCs on v7x
        ),
        cost_estimate=pl.CostEstimate(
            flops=2 * B * IN_FEATURES * OUT_FEATURES,
            transcendentals=0,
            bytes_accessed=bytes_accessed,
        ),
    )(x, w_t, b_row)

    return out


if __name__ == "__main__":
    key = jax.random.PRNGKey(0)
    kx, kw, kb, kx2 = jax.random.split(key, 4)

    # Deterministic params mimicking nn.Linear's U(-1/sqrt(in), 1/sqrt(in)).
    bound = 1.0 / (IN_FEATURES ** 0.5)
    weight = jax.random.uniform(kw, (OUT_FEATURES, IN_FEATURES),
                                minval=-bound, maxval=bound, dtype=jnp.float32)
    bias = jax.random.uniform(kb, (OUT_FEATURES,),
                              minval=-bound, maxval=bound, dtype=jnp.float32)

    # Small case (B=8): single grid step, exact f32 path, direct (B, 30) output.
    x_small = jax.random.normal(kx, (8, IN_FEATURES), dtype=jnp.float32)
    out_small = jax.block_until_ready(nestmlp_forward(x_small, weight, bias))
    ref_small = jnp.maximum(x_small @ weight.T + bias, 0.0)
    assert out_small.shape == (8, OUT_FEATURES)
    assert jnp.allclose(out_small, ref_small, atol=1e-5, rtol=1e-5)

    # Larger case (B=300, tb=128): multi-step grid with a masked partial tail
    # block (no wrapper-side jnp.pad), f32 path.
    x_big = jax.random.normal(kx2, (300, IN_FEATURES), dtype=jnp.float32)
    out_big = jax.block_until_ready(nestmlp_forward(x_big, weight, bias, tb=128))
    ref_big = jnp.maximum(x_big @ weight.T + bias, 0.0)
    assert out_big.shape == (300, OUT_FEATURES)
    assert jnp.allclose(out_big, ref_big, atol=1e-5, rtol=1e-5)

    # bf16 x arriving from upstream (no wrapper-side cast in the kernel path)
    # plus bf16 output stream; weights stay f32 in HBM, cast in-kernel,
    # f32 accumulate + f32 bias/ReLU epilogue.
    x_bf16 = x_big.astype(jnp.bfloat16)
    out_bf16 = jax.block_until_ready(
        nestmlp_forward(x_bf16, weight, bias, tb=128, out_dtype=jnp.bfloat16))
    assert out_bf16.shape == (300, OUT_FEATURES)
    assert out_bf16.dtype == jnp.bfloat16
    assert jnp.allclose(out_bf16.astype(jnp.float32), ref_big, atol=5e-2, rtol=5e-2)

    print("KERNEL_OK")
</pallas_src>

<mosaic_0001>
module attributes {stable_mosaic.version = 11 : i64} {
  func.func @nestmlp_kernel(%arg0: i32, %arg1: memref<8x40xf32, #tpu.memory_space<vmem>>, %arg2: memref<40x30xf32, #tpu.memory_space<vmem>>, %arg3: memref<1x30xf32, #tpu.memory_space<vmem>>, %arg4: memref<8x30xf32, #tpu.memory_space<vmem>>) attributes {dimension_semantics = [#tpu.dimension_semantics<parallel>], iteration_bounds = array<i64: 1>, scalar_prefetch = 0 : i64, scratch_operands = 0 : i64, tpu.core_type = #tpu.core_type<tc>, window_params = [{transform_indices = @transform_0, window_bounds = array<i64: 8, 40>}, {pipeline_mode = #tpu.pipeline_mode<synchronous>, transform_indices = @transform_1, window_bounds = array<i64: 40, 30>}, {pipeline_mode = #tpu.pipeline_mode<synchronous>, transform_indices = @transform_2, window_bounds = array<i64: 1, 30>}, {transform_indices = @transform_3, window_bounds = array<i64: 8, 30>}]} {
    %c0 = arith.constant 0 : index
    %c0_0 = arith.constant 0 : index
    %0 = vector.load %arg1[%c0, %c0_0] : memref<8x40xf32, #tpu.memory_space<vmem>>, vector<8x40xf32>
    %c0_1 = arith.constant 0 : index
    %c0_2 = arith.constant 0 : index
    %1 = vector.load %arg2[%c0_1, %c0_2] : memref<40x30xf32, #tpu.memory_space<vmem>>, vector<40x30xf32>
    %cst = arith.constant dense<0.000000e+00> : vector<8x30xf32>
    %2 = tpu.matmul %0, %1, %cst {dimension_numbers = #tpu.dot_dimension_numbers<[1], [0], [0], [1], [0, 0, 1, 1], [], []>} : vector<8x40xf32>, vector<40x30xf32>, vector<8x30xf32> -> vector<8x30xf32>
    %c0_3 = arith.constant 0 : index
    %c0_4 = arith.constant 0 : index
    %3 = vector.load %arg3[%c0_3, %c0_4] : memref<1x30xf32, #tpu.memory_space<vmem>>, vector<1x30xf32>
    %4 = vector.broadcast %3 : vector<1x30xf32> to vector<8x30xf32>
    %5 = arith.addf %2, %4 : vector<8x30xf32>
    %cst_5 = arith.constant 0.000000e+00 : f32
    %6 = vector.broadcast %cst_5 : f32 to vector<8x30xf32>
    %7 = arith.maximumf %5, %6 : vector<8x30xf32>
    %c0_6 = arith.constant 0 : index
    %c0_7 = arith.constant 0 : index
    %8 = vector.load %arg4[%c0_6, %c0_7] : memref<8x30xf32, #tpu.memory_space<vmem>>, vector<8x30xf32>
    tpu.vector_store %arg4[%c0_6, %c0_7], %7 {strides = array<i32>} : memref<8x30xf32, #tpu.memory_space<vmem>>, vector<8x30xf32>,
    return
  }
  func.func @transform_0(%arg0: i32) -> (i32, i32) {
    %c0_i32 = arith.constant 0 : i32
    %c0_i32_0 = arith.constant 0 : i32
    return %arg0, %c0_i32 : i32, i32
  }
  func.func @transform_1(%arg0: i32) -> (i32, i32) {
    %c0_i32 = arith.constant 0 : i32
    %c0_i32_0 = arith.constant 0 : i32
    %c0_i32_1 = arith.constant 0 : i32
    return %c0_i32, %c0_i32_0 : i32, i32
  }
  func.func @transform_2(%arg0: i32) -> (i32, i32) {
    %c0_i32 = arith.constant 0 : i32
    %c0_i32_0 = arith.constant 0 : i32
    %c0_i32_1 = arith.constant 0 : i32
    return %c0_i32, %c0_i32_0 : i32, i32
  }
  func.func @transform_3(%arg0: i32) -> (i32, i32) {
    %c0_i32 = arith.constant 0 : i32
    %c0_i32_0 = arith.constant 0 : i32
    return %arg0, %c0_i32 : i32, i32
  }
}

</mosaic_0001>

<bundles_post_ra>
// kernel: nestmlp_forward.1
= control target key start
LH: loop header
LB: loop body
LE: loop exit
PB: predicated region body
PF: predicated region fallthrough
CT: control target
= control target key end

     0   :  { %v165_v1 = vmov 0.0   ;;  %vm166_vm0 = vmmov 0   ;;  %s212_s0 = inlined_call_operand.vmem [shape: f32[8,40], index: 0, kind: input, shape index: {}]   ;;  %s213_s1 = inlined_call_operand.vmem [shape: f32[40,30], index: 1, kind: input, shape index: {}]   ;;  %s214_s2 = inlined_call_operand.vmem [shape: f32[1,30], index: 2, kind: input, shape index: {}]   ;;  %s215_s3 = inlined_call_operand.hbm [shape: f32[8,30], index: 3, kind: output, shape index: {}]  }
   0x1   :  { %v20_v0 = vld [vmem:[%s213_s1 + $0x20] sm:$0xff]  ;;  %127 = vmatprep.subr.mxu0 %v165_v1  ;;  %v19_v2 = vld [vmem:[%s213_s1 + $0x18] sm:$0xff]  ;;  %137 = vmatprep.mubr.msk.f32.mxu0 %vm166_vm0, %v165_v1 }
   0x2   :  { %128 = vmatpush3.msra.mxu0 %v20_v0 }
   0x3   :  { %8 = vsyncpa [#allocation3], 0  ;;  %129 = vmatprep.subr.mxu0 %v165_v1  ;;  %v18_v3 = vld [vmem:[%s213_s1 + $0x10] sm:$0xff]  ;;  %v17_v4 = vld [vmem:[%s213_s1 + $0x8] sm:$0xff]  ;;  %vm28_vm1 = vcmask 326656   ;;  %s167_s26 = smov [#allocation2]  }
   0x4   :  { %130 = vmatpush3.msra.mxu0 %v19_v2  ;;  %v16_v5 = vld [vmem:[%s213_s1] sm:$0xff]  ;;  %s111_s27 = sshll.u32 %s167_s26, 4  ;;  %vm103_vm2 = vcmask 244736   ;;  %s112_s27 = int_to_ptr.vmem [resolvable:$true] %s111_s27 }
   0x5   :  { %131 = vmatprep.subr.mxu0 %v165_v1  ;;  %v15_v6 = vld [vmem:[%s212_s0] sm:$0xff]  ;;  %s143_s1 = scalar_lea.vmem %s112_s27, 128  ;;  %p148_p1 = scmp.lt.s32.totalorder %s112_s27, %s112_s27 }
   0x6   :  { %132 = vmatpush3.msra.mxu0 %v18_v3  ;;  %v119_v7 = vld [vmem:[%s214_s2] ss:$0 sm:$0xff]  ;;  %p144_p0 = scmp.ne.s32.totalorder %s112_s27, %s143_s1  ;;  %p149_p2 = scmp.lt.s32.totalorder %s143_s1, %s143_s1 }
   0x7   :  { %133 = vmatprep.subr.mxu0 %v165_v1 }
   0x8   :  { %134 = vmatpush3.msra.mxu0 %v17_v4  ;;  %p150_p3 = por %p149_p2, %p148_p1 }
   0x9   :  { %135 = vmatprep.subr.mxu0 %v165_v1 }
   0xa   :  { %136 = vmatpush3.msra.mxu0 %v16_v5  ;;  %p151_p4 = pnand %p150_p3, %p144_p0 }
   0xb   :  { %138 = vmatmul.mubr.msk.f32.vlgmr.msra.gmra.mxu0 %vm28_vm1, %v15_v6 }
  0xcb   :  { %v98_v8 = vpop.f32.mrf.mxu0 }
  0xcc   :  { %v99_v9 = vadd.f32 %v119_v7, %v98_v8 }
  0xcd   :  { %v139_v10 = vpop.f32.mrf.mxu0 }
  0xce   :  { %v102_v11 = vmax.f32 %v99_v9, 0.0 }
  0xd0   :  { %104 = vst.msk [vmem:[#allocation2] sm:$0xff] %vm103_vm2, %v102_v11 }
  0xd1   :  { %154 = shalt.err (!%p151_p4)
}
  0xd2   :  { %114 = dma.vmem_to_hbm [thread:$0]  %s112_s27, 128, %s215_s3, [#allocation3]  }
  0xd3   :  { %163 = dma.done.wait [#allocation3], 128  }
  0xd4   :  { %164 = vsyncadd [#allocation3], 4294967168 }
  0xd5   :  { %118 = vsyncpa [#allocation3], 1 }

</bundles_post_ra>
